<compile_context>
chip_gen: v7x
topology: tpu7x:2x2x1
jax: 0.10.0
libtpu: 0.0.40
codegen_flags: <defaults>
</compile_context>

<pallas_src>
import functools

import jax
import jax.numpy as jnp
from jax import lax
from jax.experimental import pallas as pl
from jax.experimental.pallas import tpu as pltpu


def _make_sep_conv_kernel(K, pad, H2, W2, NB, Cmid, Cout):
    """Per-batch-tile kernel (static shape params baked in via closure)."""
    Lrow = NB * W2                 # lanes per pooled-output row across the tile
    Lz = H2 * Lrow                 # lanes per (row-parity, col-parity) slab
    Lyb = (H2 + pad) * Lrow        # slab rows + halo rows, flattened on lanes

    def kernel(xs_ref, w1t_ref, b1_ref, w2t_ref, b2_ref, out_ref, ybuf):
        # xs_ref : [K*Cin, 4*Lz]   im2col input, lane order (b, c, i, n, j)
        # w1t_ref: [Cmid, K*Cin]
        # b1_ref : [Cmid, 1]
        # w2t_ref: [K, Cout, Cmid]
        # b2_ref : [Cout, 1]
        # out_ref: [Cout, Lz]      pooled output, lane order (u, n, j)
        # ybuf   : VMEM [2, 2, Cmid, Lyb]; ybuf[b, p, :, (u*NB + n)*W2 + j]
        #          holds the height-padded conv_1xn output at padded row
        #          2u + p, column 2j + b of image n in this tile.

        # ---- conv_1xn: one lane-dense im2col matmul for the whole tile ----
        y_all = jnp.dot(w1t_ref[...], xs_ref[...],
                        preferred_element_type=jnp.float32) + b1_ref[...]

        # ---- scatter into per-parity halo slabs (zero ONLY the halo rows) ----
        for b in range(2):                 # column parity of the conv_1xn output
            for c in range(2):             # row parity of the conv_1xn output
                p = (pad + c) & 1                  # parity inside height-padded y
                lo = ((pad + c) // 2) * Lrow       # start of the valid block
                blk = y_all[:, (2 * b + c) * Lz:(2 * b + c + 1) * Lz]
                if lo > 0:
                    ybuf[b, p, :, :lo] = jnp.zeros((Cmid, lo), jnp.float32)
                ybuf[b, p, :, lo:lo + Lz] = blk
                if lo + Lz < Lyb:
                    ybuf[b, p, :, lo + Lz:] = jnp.zeros(
                        (Cmid, Lyb - lo - Lz), jnp.float32)

        # ---- conv_nx1 + bias + ReLU + 2x2 max-pool, fused (no z scratch) ----
        w2_all = w2t_ref[...]              # hoisted weight load: [K, Cout, Cmid]
        b2 = b2_ref[...]
        pooled = None
        for a in range(2):                 # pool-partner row parity
            for b in range(2):             # pool-partner column parity
                acc = None
                for k2 in range(K):
                    s = a + k2
                    off = (s // 2) * Lrow
                    part = jnp.dot(w2_all[k2],
                                   ybuf[b, s & 1, :, off:off + Lz],
                                   preferred_element_type=jnp.float32)
                    acc = part if acc is None else acc + part
                zab = jnp.maximum(acc + b2, 0.0)
                pooled = zab if pooled is None else jnp.maximum(pooled, zab)
        out_ref[...] = pooled              # single lane-dense store per tile

    return kernel


def _pick_batch_tile(N, Cin, K, H2, W2):
    """Smallest divisor of N giving >=128 output lanes, VMEM-bounded."""
    lanes_per_img = H2 * W2
    bytes_per_img = K * Cin * 4 * lanes_per_img * 4   # im2col f32 block per image
    budget = 2 << 20                                  # keep blocks well in VMEM
    divs = [d for d in range(1, N + 1) if N % d == 0]
    fitting = [d for d in divs if d * bytes_per_img <= budget] or [1]
    for d in fitting:
        if d * lanes_per_img >= 128:
            return d
    return fitting[-1]


@functools.partial(jax.jit, static_argnames=("pad",))
def spatially_separable_conv_block(x_nchw, w1, b1, w2, b2, *, pad):
    """Forward pass matching the PyTorch module.

    x_nchw: [N, Cin, H, W] float32
    w1:     [K, Cin, Cmid]  == torch conv_1xn.weight[cm, ci, 0, k]
    b1:     [Cmid]
    w2:     [K, Cmid, Cout] == torch conv_nx1.weight[co, cm, k, 0]
    b2:     [Cout]
    returns [N, Cout, H//2, W//2] float32
    """
    N, Cin, H, W = x_nchw.shape
    K, _, Cmid = w1.shape
    Cout = w2.shape[2]
    assert K == 2 * pad + 1, "kernel assumes kernel_size == 2*padding + 1"
    assert H % 2 == 0 and W % 2 == 0, "MaxPool2d(2) path assumes even H and W"
    H2, W2 = H // 2, W // 2
    NB = _pick_batch_tile(N, Cin, K, H2, W2)          # images per grid step
    NT = N // NB
    Lrow = NB * W2
    Lz = H2 * Lrow

    x = x_nchw.astype(jnp.float32)
    x_padw = jnp.pad(x, ((0, 0), (0, 0), (0, 0), (pad, pad)))   # [N, Cin, H, W+2p]

    # im2col with the 2x2-pool parity split folded in (wrapper-side layout
    # plumbing): xs0[n, k, ci, b, c, i, j] = x_padw[n, ci, 2i + c, 2j + b + k]
    taps = []
    for k in range(K):
        cols = []
        for b in range(2):
            rows = []
            for c in range(2):
                s = x_padw[:, :, c::2, b + k::2][:, :, :H2, :W2]  # [N,Cin,H2,W2]
                rows.append(s)
            cols.append(jnp.stack(rows, axis=2))                  # [N,Cin,2(c),H2,W2]
        taps.append(jnp.stack(cols, axis=2))                      # [N,Cin,2(b),2(c),H2,W2]
    xs = jnp.stack(taps, axis=1)                                  # [N,K,Cin,2,2,H2,W2]
    # fold the batch tile onto lanes: (tile, K*Cin, (b, c, i, n_loc, j))
    xs = xs.reshape(NT, NB, K, Cin, 2, 2, H2, W2)
    xs = jnp.transpose(xs, (0, 2, 3, 4, 5, 6, 1, 7))
    xs = xs.reshape(NT, K * Cin, 4 * Lz)

    w1t = w1.astype(jnp.float32).reshape(K * Cin, Cmid).T         # [Cmid, K*Cin]
    w2t = jnp.transpose(w2.astype(jnp.float32), (0, 2, 1))        # [K, Cout, Cmid]
    b1c = b1.astype(jnp.float32).reshape(Cmid, 1)
    b2c = b2.astype(jnp.float32).reshape(Cout, 1)

    grid_spec = pltpu.PrefetchScalarGridSpec(
        num_scalar_prefetch=0,
        grid=(NT,),
        in_specs=[
            pl.BlockSpec((None, K * Cin, 4 * Lz), lambda t: (t, 0, 0)),
            pl.BlockSpec((Cmid, K * Cin), lambda t: (0, 0)),
            pl.BlockSpec((Cmid, 1), lambda t: (0, 0)),
            pl.BlockSpec((K, Cout, Cmid), lambda t: (0, 0, 0)),
            pl.BlockSpec((Cout, 1), lambda t: (0, 0)),
        ],
        out_specs=pl.BlockSpec((None, Cout, Lz), lambda t: (t, 0, 0)),
        scratch_shapes=[pltpu.VMEM((2, 2, Cmid, (H2 + pad) * Lrow), jnp.float32)],
    )

    out = pl.pallas_call(
        _make_sep_conv_kernel(K, pad, H2, W2, NB, Cmid, Cout),
        out_shape=jax.ShapeDtypeStruct((NT, Cout, Lz), jnp.float32),
        grid_spec=grid_spec,
        compiler_params=pltpu.CompilerParams(
            dimension_semantics=("parallel",)),   # v7x: 2 TCs split the tiles
    )(xs, w1t, b1c, w2t, b2c)

    # lanes are (u, n_loc, j) -> [N, Cout, H2, W2]
    out = out.reshape(NT, Cout, H2, NB, W2)
    out = jnp.transpose(out, (0, 3, 1, 2, 4)).reshape(N, Cout, H2, W2)
    return out


def _reference(x_nchw, w1, b1, w2, b2, pad):
    """Pure-JAX reference mirroring the PyTorch forward exactly (NCHW)."""
    w1_oihw = jnp.transpose(w1, (2, 1, 0))[:, :, None, :]   # [Cmid, Cin, 1, K]
    w2_oihw = jnp.transpose(w2, (2, 1, 0))[:, :, :, None]   # [Cout, Cmid, K, 1]
    dn = ('NCHW', 'OIHW', 'NCHW')
    y = lax.conv_general_dilated(x_nchw, w1_oihw, (1, 1),
                                 ((0, 0), (pad, pad)), dimension_numbers=dn)
    y = y + b1.reshape(1, -1, 1, 1)
    z = lax.conv_general_dilated(y, w2_oihw, (1, 1),
                                 ((pad, pad), (0, 0)), dimension_numbers=dn)
    z = jnp.maximum(z + b2.reshape(1, -1, 1, 1), 0.0)
    return lax.reduce_window(z, -jnp.inf, lax.max,
                             (1, 1, 2, 2), (1, 1, 2, 2), 'VALID')


if __name__ == "__main__":
    N, Cin, Cout, H, W = 2, 4, 8, 16, 16
    K, PAD = 3, 1

    key = jax.random.PRNGKey(0)
    kx, kw1, kb1, kw2, kb2 = jax.random.split(key, 5)
    x = jax.random.normal(kx, (N, Cin, H, W), jnp.float32)
    w1 = jax.random.normal(kw1, (K, Cin, Cin), jnp.float32) * 0.2
    b1 = jax.random.normal(kb1, (Cin,), jnp.float32) * 0.1
    w2 = jax.random.normal(kw2, (K, Cin, Cout), jnp.float32) * 0.2
    b2 = jax.random.normal(kb2, (Cout,), jnp.float32) * 0.1

    out = spatially_separable_conv_block(x, w1, b1, w2, b2, pad=PAD)
    out = jax.block_until_ready(out)

    ref = _reference(x, w1, b1, w2, b2, PAD)
    assert out.shape == (N, Cout, H // 2, W // 2), out.shape
    assert jnp.allclose(out, ref, atol=2e-4, rtol=2e-4)
    print("KERNEL_OK")
</pallas_src>

<mosaic_0001>
module attributes {stable_mosaic.version = 11 : i64} {
  func.func @kernel(%arg0: i32, %arg1: memref<1x12x512xf32, #tpu.memory_space<vmem>>, %arg2: memref<4x12xf32, #tpu.memory_space<vmem>>, %arg3: memref<4x1xf32, #tpu.memory_space<vmem>>, %arg4: memref<3x8x4xf32, #tpu.memory_space<vmem>>, %arg5: memref<8x1xf32, #tpu.memory_space<vmem>>, %arg6: memref<1x8x128xf32, #tpu.memory_space<vmem>>, %arg7: memref<2x2x4x144xf32, #tpu.memory_space<vmem>>) attributes {dimension_semantics = [#tpu.dimension_semantics<parallel>], iteration_bounds = array<i64: 1>, scalar_prefetch = 0 : i64, scratch_operands = 1 : i64, tpu.core_type = #tpu.core_type<tc>, window_params = [{transform_indices = @transform_0, window_bounds = array<i64: 1, 12, 512>}, {pipeline_mode = #tpu.pipeline_mode<synchronous>, transform_indices = @transform_1, window_bounds = array<i64: 4, 12>}, {pipeline_mode = #tpu.pipeline_mode<synchronous>, transform_indices = @transform_2, window_bounds = array<i64: 4, 1>}, {pipeline_mode = #tpu.pipeline_mode<synchronous>, transform_indices = @transform_3, window_bounds = array<i64: 3, 8, 4>}, {pipeline_mode = #tpu.pipeline_mode<synchronous>, transform_indices = @transform_4, window_bounds = array<i64: 8, 1>}, {transform_indices = @transform_5, window_bounds = array<i64: 1, 8, 128>}]} {
    %c0 = arith.constant 0 : index
    %c0_0 = arith.constant 0 : index
    %0 = vector.load %arg2[%c0, %c0_0] : memref<4x12xf32, #tpu.memory_space<vmem>>, vector<4x12xf32>
    %c0_1 = arith.constant 0 : index
    %c0_2 = arith.constant 0 : index
    %c0_3 = arith.constant 0 : index
    %1 = vector.load %arg1[%c0_1, %c0_2, %c0_3] : memref<1x12x512xf32, #tpu.memory_space<vmem>>, vector<1x12x512xf32>
    %2 = vector.shape_cast %1 : vector<1x12x512xf32> to vector<12x512xf32>
    %cst = arith.constant dense<0.000000e+00> : vector<4x512xf32>
    %3 = tpu.matmul %0, %2, %cst {dimension_numbers = #tpu.dot_dimension_numbers<[1], [0], [0], [1], [0, 0, 1, 1], [], []>} : vector<4x12xf32>, vector<12x512xf32>, vector<4x512xf32> -> vector<4x512xf32>
    %c0_4 = arith.constant 0 : index
    %c0_5 = arith.constant 0 : index
    %4 = vector.load %arg3[%c0_4, %c0_5] : memref<4x1xf32, #tpu.memory_space<vmem>>, vector<4x1xf32>
    %5 = vector.broadcast %4 : vector<4x1xf32> to vector<4x512xf32>
    %6 = arith.addf %3, %5 : vector<4x512xf32>
    %7 = vector.extract_strided_slice %6 {offsets = [0, 0], sizes = [4, 128], strides = [1, 1]} : vector<4x512xf32> to vector<4x128xf32>
    %c0_6 = arith.constant 0 : index
    %c1 = arith.constant 1 : index
    %c0_7 = arith.constant 0 : index
    %c0_8 = arith.constant 0 : index
    %8 = vector.load %arg7[%c0_6, %c1, %c0_7, %c0_8] : memref<2x2x4x144xf32, #tpu.memory_space<vmem>>, vector<1x1x4x128xf32>
    %9 = vector.shape_cast %8 : vector<1x1x4x128xf32> to vector<4x128xf32>
    %10 = vector.shape_cast %7 : vector<4x128xf32> to vector<1x1x4x128xf32>
    tpu.vector_store %arg7[%c0_6, %c1, %c0_7, %c0_8], %10 {strides = array<i32>} : memref<2x2x4x144xf32, #tpu.memory_space<vmem>>, vector<1x1x4x128xf32>,
    %cst_9 = arith.constant 0.000000e+00 : f32
    %11 = vector.broadcast %cst_9 : f32 to vector<4x16xf32>
    %c0_10 = arith.constant 0 : index
    %c1_11 = arith.constant 1 : index
    %c0_12 = arith.constant 0 : index
    %c128 = arith.constant 128 : index
    %12 = vector.load %arg7[%c0_10, %c1_11, %c0_12, %c128] : memref<2x2x4x144xf32, #tpu.memory_space<vmem>>, vector<1x1x4x16xf32>
    %13 = vector.shape_cast %12 : vector<1x1x4x16xf32> to vector<4x16xf32>
    %14 = vector.shape_cast %11 : vector<4x16xf32> to vector<1x1x4x16xf32>
    tpu.vector_store %arg7[%c0_10, %c1_11, %c0_12, %c128], %14 {strides = array<i32>} : memref<2x2x4x144xf32, #tpu.memory_space<vmem>>, vector<1x1x4x16xf32>,
    %15 = vector.extract_strided_slice %6 {offsets = [0, 128], sizes = [4, 128], strides = [1, 1]} : vector<4x512xf32> to vector<4x128xf32>
    %cst_13 = arith.constant 0.000000e+00 : f32
    %16 = vector.broadcast %cst_13 : f32 to vector<4x16xf32>
    %c0_14 = arith.constant 0 : index
    %c0_15 = arith.constant 0 : index
    %c0_16 = arith.constant 0 : index
    %c0_17 = arith.constant 0 : index
    %17 = vector.load %arg7[%c0_14, %c0_15, %c0_16, %c0_17] : memref<2x2x4x144xf32, #tpu.memory_space<vmem>>, vector<1x1x4x16xf32>
    %18 = vector.shape_cast %17 : vector<1x1x4x16xf32> to vector<4x16xf32>
    %19 = vector.shape_cast %16 : vector<4x16xf32> to vector<1x1x4x16xf32>
    tpu.vector_store %arg7[%c0_14, %c0_15, %c0_16, %c0_17], %19 {strides = array<i32>} : memref<2x2x4x144xf32, #tpu.memory_space<vmem>>, vector<1x1x4x16xf32>,
    %c0_18 = arith.constant 0 : index
    %c0_19 = arith.constant 0 : index
    %c0_20 = arith.constant 0 : index
    %c16 = arith.constant 16 : index
    %20 = vector.load %arg7[%c0_18, %c0_19, %c0_20, %c16] : memref<2x2x4x144xf32, #tpu.memory_space<vmem>>, vector<1x1x4x128xf32>
    %21 = vector.shape_cast %20 : vector<1x1x4x128xf32> to vector<4x128xf32>
    %22 = vector.shape_cast %15 : vector<4x128xf32> to vector<1x1x4x128xf32>
    tpu.vector_store %arg7[%c0_18, %c0_19, %c0_20, %c16], %22 {strides = array<i32>} : memref<2x2x4x144xf32, #tpu.memory_space<vmem>>, vector<1x1x4x128xf32>,
    %23 = vector.extract_strided_slice %6 {offsets = [0, 256], sizes = [4, 128], strides = [1, 1]} : vector<4x512xf32> to vector<4x128xf32>
    %c1_21 = arith.constant 1 : index
    %c1_22 = arith.constant 1 : index
    %c0_23 = arith.constant 0 : index
    %c0_24 = arith.constant 0 : index
    %24 = vector.load %arg7[%c1_21, %c1_22, %c0_23, %c0_24] : memref<2x2x4x144xf32, #tpu.memory_space<vmem>>, vector<1x1x4x128xf32>
    %25 = vector.shape_cast %24 : vector<1x1x4x128xf32> to vector<4x128xf32>
    %26 = vector.shape_cast %23 : vector<4x128xf32> to vector<1x1x4x128xf32>
    tpu.vector_store %arg7[%c1_21, %c1_22, %c0_23, %c0_24], %26 {strides = array<i32>} : memref<2x2x4x144xf32, #tpu.memory_space<vmem>>, vector<1x1x4x128xf32>,
    %cst_25 = arith.constant 0.000000e+00 : f32
    %27 = vector.broadcast %cst_25 : f32 to vector<4x16xf32>
    %c1_26 = arith.constant 1 : index
    %c1_27 = arith.constant 1 : index
    %c0_28 = arith.constant 0 : index
    %c128_29 = arith.constant 128 : index
    %28 = vector.load %arg7[%c1_26, %c1_27, %c0_28, %c128_29] : memref<2x2x4x144xf32, #tpu.memory_space<vmem>>, vector<1x1x4x16xf32>
    %29 = vector.shape_cast %28 : vector<1x1x4x16xf32> to vector<4x16xf32>
    %30 = vector.shape_cast %27 : vector<4x16xf32> to vector<1x1x4x16xf32>
    tpu.vector_store %arg7[%c1_26, %c1_27, %c0_28, %c128_29], %30 {strides = array<i32>} : memref<2x2x4x144xf32, #tpu.memory_space<vmem>>, vector<1x1x4x16xf32>,
    %31 = vector.extract_strided_slice %6 {offsets = [0, 384], sizes = [4, 128], strides = [1, 1]} : vector<4x512xf32> to vector<4x128xf32>
    %cst_30 = arith.constant 0.000000e+00 : f32
    %32 = vector.broadcast %cst_30 : f32 to vector<4x16xf32>
    %c1_31 = arith.constant 1 : index
    %c0_32 = arith.constant 0 : index
    %c0_33 = arith.constant 0 : index
    %c0_34 = arith.constant 0 : index
    %33 = vector.load %arg7[%c1_31, %c0_32, %c0_33, %c0_34] : memref<2x2x4x144xf32, #tpu.memory_space<vmem>>, vector<1x1x4x16xf32>
    %34 = vector.shape_cast %33 : vector<1x1x4x16xf32> to vector<4x16xf32>
    %35 = vector.shape_cast %32 : vector<4x16xf32> to vector<1x1x4x16xf32>
    tpu.vector_store %arg7[%c1_31, %c0_32, %c0_33, %c0_34], %35 {strides = array<i32>} : memref<2x2x4x144xf32, #tpu.memory_space<vmem>>, vector<1x1x4x16xf32>,
    %c1_35 = arith.constant 1 : index
    %c0_36 = arith.constant 0 : index
    %c0_37 = arith.constant 0 : index
    %c16_38 = arith.constant 16 : index
    %36 = vector.load %arg7[%c1_35, %c0_36, %c0_37, %c16_38] : memref<2x2x4x144xf32, #tpu.memory_space<vmem>>, vector<1x1x4x128xf32>
    %37 = vector.shape_cast %36 : vector<1x1x4x128xf32> to vector<4x128xf32>
    %38 = vector.shape_cast %31 : vector<4x128xf32> to vector<1x1x4x128xf32>
    tpu.vector_store %arg7[%c1_35, %c0_36, %c0_37, %c16_38], %38 {strides = array<i32>} : memref<2x2x4x144xf32, #tpu.memory_space<vmem>>, vector<1x1x4x128xf32>,
    %c0_39 = arith.constant 0 : index
    %c0_40 = arith.constant 0 : index
    %c0_41 = arith.constant 0 : index
    %39 = vector.load %arg4[%c0_39, %c0_40, %c0_41] : memref<3x8x4xf32, #tpu.memory_space<vmem>>, vector<3x8x4xf32>
    %c0_42 = arith.constant 0 : index
    %c0_43 = arith.constant 0 : index
    %40 = vector.load %arg5[%c0_42, %c0_43] : memref<8x1xf32, #tpu.memory_space<vmem>>, vector<8x1xf32>
    %41 = vector.extract_strided_slice %39 {offsets = [0, 0, 0], sizes = [1, 8, 4], strides = [1, 1, 1]} : vector<3x8x4xf32> to vector<1x8x4xf32>
    %42 = vector.shape_cast %41 : vector<1x8x4xf32> to vector<8x4xf32>
    %c0_44 = arith.constant 0 : index
    %c0_45 = arith.constant 0 : index
    %c0_46 = arith.constant 0 : index
    %c0_47 = arith.constant 0 : index
    %43 = vector.load %arg7[%c0_44, %c0_45, %c0_46, %c0_47] : memref<2x2x4x144xf32, #tpu.memory_space<vmem>>, vector<1x1x4x128xf32>
    %44 = vector.shape_cast %43 : vector<1x1x4x128xf32> to vector<4x128xf32>
    %cst_48 = arith.constant dense<0.000000e+00> : vector<8x128xf32>
    %45 = tpu.matmul %42, %44, %cst_48 {dimension_numbers = #tpu.dot_dimension_numbers<[1], [0], [0], [1], [0, 0, 1, 1], [], []>} : vector<8x4xf32>, vector<4x128xf32>, vector<8x128xf32> -> vector<8x128xf32>
    %46 = vector.extract_strided_slice %39 {offsets = [1, 0, 0], sizes = [1, 8, 4], strides = [1, 1, 1]} : vector<3x8x4xf32> to vector<1x8x4xf32>
    %47 = vector.shape_cast %46 : vector<1x8x4xf32> to vector<8x4xf32>
    %c0_49 = arith.constant 0 : index
    %c1_50 = arith.constant 1 : index
    %c0_51 = arith.constant 0 : index
    %c0_52 = arith.constant 0 : index
    %48 = vector.load %arg7[%c0_49, %c1_50, %c0_51, %c0_52] : memref<2x2x4x144xf32, #tpu.memory_space<vmem>>, vector<1x1x4x128xf32>
    %49 = vector.shape_cast %48 : vector<1x1x4x128xf32> to vector<4x128xf32>
    %cst_53 = arith.constant dense<0.000000e+00> : vector<8x128xf32>
    %50 = tpu.matmul %47, %49, %cst_53 {dimension_numbers = #tpu.dot_dimension_numbers<[1], [0], [0], [1], [0, 0, 1, 1], [], []>} : vector<8x4xf32>, vector<4x128xf32>, vector<8x128xf32> -> vector<8x128xf32>
    %51 = arith.addf %45, %50 : vector<8x128xf32>
    %52 = vector.extract_strided_slice %39 {offsets = [2, 0, 0], sizes = [1, 8, 4], strides = [1, 1, 1]} : vector<3x8x4xf32> to vector<1x8x4xf32>
    %53 = vector.shape_cast %52 : vector<1x8x4xf32> to vector<8x4xf32>
    %c0_54 = arith.constant 0 : index
    %c0_55 = arith.constant 0 : index
    %c0_56 = arith.constant 0 : index
    %c16_57 = arith.constant 16 : index
    %54 = vector.load %arg7[%c0_54, %c0_55, %c0_56, %c16_57] : memref<2x2x4x144xf32, #tpu.memory_space<vmem>>, vector<1x1x4x128xf32>
    %55 = vector.shape_cast %54 : vector<1x1x4x128xf32> to vector<4x128xf32>
    %cst_58 = arith.constant dense<0.000000e+00> : vector<8x128xf32>
    %56 = tpu.matmul %53, %55, %cst_58 {dimension_numbers = #tpu.dot_dimension_numbers<[1], [0], [0], [1], [0, 0, 1, 1], [], []>} : vector<8x4xf32>, vector<4x128xf32>, vector<8x128xf32> -> vector<8x128xf32>
    %57 = arith.addf %51, %56 : vector<8x128xf32>
    %58 = vector.broadcast %40 : vector<8x1xf32> to vector<8x128xf32>
    %59 = arith.addf %57, %58 : vector<8x128xf32>
    %cst_59 = arith.constant 0.000000e+00 : f32
    %60 = vector.broadcast %cst_59 : f32 to vector<8x128xf32>
    %61 = arith.maximumf %59, %60 : vector<8x128xf32>
    %62 = vector.extract_strided_slice %39 {offsets = [0, 0, 0], sizes = [1, 8, 4], strides = [1, 1, 1]} : vector<3x8x4xf32> to vector<1x8x4xf32>
    %63 = vector.shape_cast %62 : vector<1x8x4xf32> to vector<8x4xf32>
    %c1_60 = arith.constant 1 : index
    %c0_61 = arith.constant 0 : index
    %c0_62 = arith.constant 0 : index
    %c0_63 = arith.constant 0 : index
    %64 = vector.load %arg7[%c1_60, %c0_61, %c0_62, %c0_63] : memref<2x2x4x144xf32, #tpu.memory_space<vmem>>, vector<1x1x4x128xf32>
    %65 = vector.shape_cast %64 : vector<1x1x4x128xf32> to vector<4x128xf32>
    %cst_64 = arith.constant dense<0.000000e+00> : vector<8x128xf32>
    %66 = tpu.matmul %63, %65, %cst_64 {dimension_numbers = #tpu.dot_dimension_numbers<[1], [0], [0], [1], [0, 0, 1, 1], [], []>} : vector<8x4xf32>, vector<4x128xf32>, vector<8x128xf32> -> vector<8x128xf32>
    %67 = vector.extract_strided_slice %39 {offsets = [1, 0, 0], sizes = [1, 8, 4], strides = [1, 1, 1]} : vector<3x8x4xf32> to vector<1x8x4xf32>
    %68 = vector.shape_cast %67 : vector<1x8x4xf32> to vector<8x4xf32>
    %c1_65 = arith.constant 1 : index
    %c1_66 = arith.constant 1 : index
    %c0_67 = arith.constant 0 : index
    %c0_68 = arith.constant 0 : index
    %69 = vector.load %arg7[%c1_65, %c1_66, %c0_67, %c0_68] : memref<2x2x4x144xf32, #tpu.memory_space<vmem>>, vector<1x1x4x128xf32>
    %70 = vector.shape_cast %69 : vector<1x1x4x128xf32> to vector<4x128xf32>
    %cst_69 = arith.constant dense<0.000000e+00> : vector<8x128xf32>
    %71 = tpu.matmul %68, %70, %cst_69 {dimension_numbers = #tpu.dot_dimension_numbers<[1], [0], [0], [1], [0, 0, 1, 1], [], []>} : vector<8x4xf32>, vector<4x128xf32>, vector<8x128xf32> -> vector<8x128xf32>
    %72 = arith.addf %66, %71 : vector<8x128xf32>
    %73 = vector.extract_strided_slice %39 {offsets = [2, 0, 0], sizes = [1, 8, 4], strides = [1, 1, 1]} : vector<3x8x4xf32> to vector<1x8x4xf32>
    %74 = vector.shape_cast %73 : vector<1x8x4xf32> to vector<8x4xf32>
    %c1_70 = arith.constant 1 : index
    %c0_71 = arith.constant 0 : index
    %c0_72 = arith.constant 0 : index
    %c16_73 = arith.constant 16 : index
    %75 = vector.load %arg7[%c1_70, %c0_71, %c0_72, %c16_73] : memref<2x2x4x144xf32, #tpu.memory_space<vmem>>, vector<1x1x4x128xf32>
    %76 = vector.shape_cast %75 : vector<1x1x4x128xf32> to vector<4x128xf32>
    %cst_74 = arith.constant dense<0.000000e+00> : vector<8x128xf32>
    %77 = tpu.matmul %74, %76, %cst_74 {dimension_numbers = #tpu.dot_dimension_numbers<[1], [0], [0], [1], [0, 0, 1, 1], [], []>} : vector<8x4xf32>, vector<4x128xf32>, vector<8x128xf32> -> vector<8x128xf32>
    %78 = arith.addf %72, %77 : vector<8x128xf32>
    %79 = vector.broadcast %40 : vector<8x1xf32> to vector<8x128xf32>
    %80 = arith.addf %78, %79 : vector<8x128xf32>
    %cst_75 = arith.constant 0.000000e+00 : f32
    %81 = vector.broadcast %cst_75 : f32 to vector<8x128xf32>
    %82 = arith.maximumf %80, %81 : vector<8x128xf32>
    %83 = arith.maximumf %61, %82 : vector<8x128xf32>
    %84 = vector.extract_strided_slice %39 {offsets = [0, 0, 0], sizes = [1, 8, 4], strides = [1, 1, 1]} : vector<3x8x4xf32> to vector<1x8x4xf32>
    %85 = vector.shape_cast %84 : vector<1x8x4xf32> to vector<8x4xf32>
    %c0_76 = arith.constant 0 : index
    %c1_77 = arith.constant 1 : index
    %c0_78 = arith.constant 0 : index
    %c0_79 = arith.constant 0 : index
    %86 = vector.load %arg7[%c0_76, %c1_77, %c0_78, %c0_79] : memref<2x2x4x144xf32, #tpu.memory_space<vmem>>, vector<1x1x4x128xf32>
    %87 = vector.shape_cast %86 : vector<1x1x4x128xf32> to vector<4x128xf32>
    %cst_80 = arith.constant dense<0.000000e+00> : vector<8x128xf32>
    %88 = tpu.matmul %85, %87, %cst_80 {dimension_numbers = #tpu.dot_dimension_numbers<[1], [0], [0], [1], [0, 0, 1, 1], [], []>} : vector<8x4xf32>, vector<4x128xf32>, vector<8x128xf32> -> vector<8x128xf32>
    %89 = vector.extract_strided_slice %39 {offsets = [1, 0, 0], sizes = [1, 8, 4], strides = [1, 1, 1]} : vector<3x8x4xf32> to vector<1x8x4xf32>
    %90 = vector.shape_cast %89 : vector<1x8x4xf32> to vector<8x4xf32>
    %c0_81 = arith.constant 0 : index
    %c0_82 = arith.constant 0 : index
    %c0_83 = arith.constant 0 : index
    %c16_84 = arith.constant 16 : index
    %91 = vector.load %arg7[%c0_81, %c0_82, %c0_83, %c16_84] : memref<2x2x4x144xf32, #tpu.memory_space<vmem>>, vector<1x1x4x128xf32>
    %92 = vector.shape_cast %91 : vector<1x1x4x128xf32> to vector<4x128xf32>
    %cst_85 = arith.constant dense<0.000000e+00> : vector<8x128xf32>
    %93 = tpu.matmul %90, %92, %cst_85 {dimension_numbers = #tpu.dot_dimension_numbers<[1], [0], [0], [1], [0, 0, 1, 1], [], []>} : vector<8x4xf32>, vector<4x128xf32>, vector<8x128xf32> -> vector<8x128xf32>
    %94 = arith.addf %88, %93 : vector<8x128xf32>
    %95 = vector.extract_strided_slice %39 {offsets = [2, 0, 0], sizes = [1, 8, 4], strides = [1, 1, 1]} : vector<3x8x4xf32> to vector<1x8x4xf32>
    %96 = vector.shape_cast %95 : vector<1x8x4xf32> to vector<8x4xf32>
    %c0_86 = arith.constant 0 : index
    %c1_87 = arith.constant 1 : index
    %c0_88 = arith.constant 0 : index
    %c16_89 = arith.constant 16 : index
    %97 = vector.load %arg7[%c0_86, %c1_87, %c0_88, %c16_89] : memref<2x2x4x144xf32, #tpu.memory_space<vmem>>, vector<1x1x4x128xf32>
    %98 = vector.shape_cast %97 : vector<1x1x4x128xf32> to vector<4x128xf32>
    %cst_90 = arith.constant dense<0.000000e+00> : vector<8x128xf32>
    %99 = tpu.matmul %96, %98, %cst_90 {dimension_numbers = #tpu.dot_dimension_numbers<[1], [0], [0], [1], [0, 0, 1, 1], [], []>} : vector<8x4xf32>, vector<4x128xf32>, vector<8x128xf32> -> vector<8x128xf32>
    %100 = arith.addf %94, %99 : vector<8x128xf32>
    %101 = vector.broadcast %40 : vector<8x1xf32> to vector<8x128xf32>
    %102 = arith.addf %100, %101 : vector<8x128xf32>
    %cst_91 = arith.constant 0.000000e+00 : f32
    %103 = vector.broadcast %cst_91 : f32 to vector<8x128xf32>
    %104 = arith.maximumf %102, %103 : vector<8x128xf32>
    %105 = arith.maximumf %83, %104 : vector<8x128xf32>
    %106 = vector.extract_strided_slice %39 {offsets = [0, 0, 0], sizes = [1, 8, 4], strides = [1, 1, 1]} : vector<3x8x4xf32> to vector<1x8x4xf32>
    %107 = vector.shape_cast %106 : vector<1x8x4xf32> to vector<8x4xf32>
    %c1_92 = arith.constant 1 : index
    %c1_93 = arith.constant 1 : index
    %c0_94 = arith.constant 0 : index
    %c0_95 = arith.constant 0 : index
    %108 = vector.load %arg7[%c1_92, %c1_93, %c0_94, %c0_95] : memref<2x2x4x144xf32, #tpu.memory_space<vmem>>, vector<1x1x4x128xf32>
    %109 = vector.shape_cast %108 : vector<1x1x4x128xf32> to vector<4x128xf32>
    %cst_96 = arith.constant dense<0.000000e+00> : vector<8x128xf32>
    %110 = tpu.matmul %107, %109, %cst_96 {dimension_numbers = #tpu.dot_dimension_numbers<[1], [0], [0], [1], [0, 0, 1, 1], [], []>} : vector<8x4xf32>, vector<4x128xf32>, vector<8x128xf32> -> vector<8x128xf32>
    %111 = vector.extract_strided_slice %39 {offsets = [1, 0, 0], sizes = [1, 8, 4], strides = [1, 1, 1]} : vector<3x8x4xf32> to vector<1x8x4xf32>
    %112 = vector.shape_cast %111 : vector<1x8x4xf32> to vector<8x4xf32>
    %c1_97 = arith.constant 1 : index
    %c0_98 = arith.constant 0 : index
    %c0_99 = arith.constant 0 : index
    %c16_100 = arith.constant 16 : index
    %113 = vector.load %arg7[%c1_97, %c0_98, %c0_99, %c16_100] : memref<2x2x4x144xf32, #tpu.memory_space<vmem>>, vector<1x1x4x128xf32>
    %114 = vector.shape_cast %113 : vector<1x1x4x128xf32> to vector<4x128xf32>
    %cst_101 = arith.constant dense<0.000000e+00> : vector<8x128xf32>
    %115 = tpu.matmul %112, %114, %cst_101 {dimension_numbers = #tpu.dot_dimension_numbers<[1], [0], [0], [1], [0, 0, 1, 1], [], []>} : vector<8x4xf32>, vector<4x128xf32>, vector<8x128xf32> -> vector<8x128xf32>
    %116 = arith.addf %110, %115 : vector<8x128xf32>
    %117 = vector.extract_strided_slice %39 {offsets = [2, 0, 0], sizes = [1, 8, 4], strides = [1, 1, 1]} : vector<3x8x4xf32> to vector<1x8x4xf32>
    %118 = vector.shape_cast %117 : vector<1x8x4xf32> to vector<8x4xf32>
    %c1_102 = arith.constant 1 : index
    %c1_103 = arith.constant 1 : index
    %c0_104 = arith.constant 0 : index
    %c16_105 = arith.constant 16 : index
    %119 = vector.load %arg7[%c1_102, %c1_103, %c0_104, %c16_105] : memref<2x2x4x144xf32, #tpu.memory_space<vmem>>, vector<1x1x4x128xf32>
    %120 = vector.shape_cast %119 : vector<1x1x4x128xf32> to vector<4x128xf32>
    %cst_106 = arith.constant dense<0.000000e+00> : vector<8x128xf32>
    %121 = tpu.matmul %118, %120, %cst_106 {dimension_numbers = #tpu.dot_dimension_numbers<[1], [0], [0], [1], [0, 0, 1, 1], [], []>} : vector<8x4xf32>, vector<4x128xf32>, vector<8x128xf32> -> vector<8x128xf32>
    %122 = arith.addf %116, %121 : vector<8x128xf32>
    %123 = vector.broadcast %40 : vector<8x1xf32> to vector<8x128xf32>
    %124 = arith.addf %122, %123 : vector<8x128xf32>
    %cst_107 = arith.constant 0.000000e+00 : f32
    %125 = vector.broadcast %cst_107 : f32 to vector<8x128xf32>
    %126 = arith.maximumf %124, %125 : vector<8x128xf32>
    %127 = arith.maximumf %105, %126 : vector<8x128xf32>
    %c0_108 = arith.constant 0 : index
    %c0_109 = arith.constant 0 : index
    %c0_110 = arith.constant 0 : index
    %128 = vector.load %arg6[%c0_108, %c0_109, %c0_110] : memref<1x8x128xf32, #tpu.memory_space<vmem>>, vector<1x8x128xf32>
    %129 = vector.shape_cast %128 : vector<1x8x128xf32> to vector<8x128xf32>
    %130 = vector.shape_cast %127 : vector<8x128xf32> to vector<1x8x128xf32>
    tpu.vector_store %arg6[%c0_108, %c0_109, %c0_110], %130 {strides = array<i32>} : memref<1x8x128xf32, #tpu.memory_space<vmem>>, vector<1x8x128xf32>,
    return
  }
  func.func @transform_0(%arg0: i32) -> (i32, i32, i32) {
    %c0_i32 = arith.constant 0 : i32
    %c0_i32_0 = arith.constant 0 : i32
    %c0_i32_1 = arith.constant 0 : i32
    return %arg0, %c0_i32, %c0_i32_0 : i32, i32, i32
  }
  func.func @transform_1(%arg0: i32) -> (i32, i32) {
    %c0_i32 = arith.constant 0 : i32
    %c0_i32_0 = arith.constant 0 : i32
    %c0_i32_1 = arith.constant 0 : i32
    return %c0_i32, %c0_i32_0 : i32, i32
  }
  func.func @transform_2(%arg0: i32) -> (i32, i32) {
    %c0_i32 = arith.constant 0 : i32
    %c0_i32_0 = arith.constant 0 : i32
    %c0_i32_1 = arith.constant 0 : i32
    return %c0_i32, %c0_i32_0 : i32, i32
  }
  func.func @transform_3(%arg0: i32) -> (i32, i32, i32) {
    %c0_i32 = arith.constant 0 : i32
    %c0_i32_0 = arith.constant 0 : i32
    %c0_i32_1 = arith.constant 0 : i32
    %c0_i32_2 = arith.constant 0 : i32
    return %c0_i32, %c0_i32_0, %c0_i32_1 : i32, i32, i32
  }
  func.func @transform_4(%arg0: i32) -> (i32, i32) {
    %c0_i32 = arith.constant 0 : i32
    %c0_i32_0 = arith.constant 0 : i32
    %c0_i32_1 = arith.constant 0 : i32
    return %c0_i32, %c0_i32_0 : i32, i32
  }
  func.func @transform_5(%arg0: i32) -> (i32, i32, i32) {
    %c0_i32 = arith.constant 0 : i32
    %c0_i32_0 = arith.constant 0 : i32
    %c0_i32_1 = arith.constant 0 : i32
    return %arg0, %c0_i32, %c0_i32_0 : i32, i32, i32
  }
}

</mosaic_0001>

<bundles_post_ra>
// kernel: spatially_separable_conv_block.1
= control target key start
LH: loop header
LB: loop body
LE: loop exit
PB: predicated region body
PF: predicated region fallthrough
CT: control target
= control target key end

     0   :  { %vm39_vm0 = vcmask 1043456   ;;  %vm1296_vm1 = vmmov 1   ;;  %v1297_v3 = vmov 0.0   ;;  %v1298_v8 = vmov 0   ;;  %s1301_s15 = smov 112   ;;  %s1480_s0 = inlined_call_operand.vmem [shape: f32[1,12,512], index: 0, kind: input, shape index: {}]   ;;  %s1481_s2 = inlined_call_operand.vmem [shape: f32[4,1], index: 2, kind: input, shape index: {}]   ;;  %s1482_s1 = inlined_call_operand.vmem [shape: f32[4,12], index: 1, kind: input, shape index: {}]   ;;  %s1483_s3 = inlined_call_operand.vmem [shape: f32[3,8,4], index: 3, kind: input, shape index: {}]   ;;  %s1484_s4 = inlined_call_operand.vmem [shape: f32[8,1], index: 4, kind: input, shape index: {}]   ;;  %s1485_s5 = inlined_call_operand.vmem [shape: f32[1,8,128], index: 5, kind: output, shape index: {}]  }
   0x1   :  { %v22_v0 = vld [vmem:[%s1480_s0 + $0x8] sm:$0xff]  ;;  %vm1339_vm2 = vmpackc.low %vm39_vm0, %vm1296_vm1  ;;  %116 = vmatprep.mubr.f32.mxu0 %v1297_v3  ;;  %187 = vmatprep.mubr.f32.mxu1 %v1297_v3  ;;  %v24_v5 = vld [vmem:[%s1480_s0 + $0x18] sm:$0xff]  ;;  %vm35_vm3 = vcmask 97280   ;;  %vm196_vm4 = vcmask 125952   ;;  %vm1299_vm5 = vmmov 0   ;;  %vm228_vm6 = vcmask 31744  }
   0x2   :  { %v26_v1 = vld [vmem:[%s1480_s0 + $0x28] sm:$0xf]  ;;  %v28_v6 = vld [vmem:[%s1480_s0 + $0x38] sm:$0xf]  ;;  %v21_v7 = vld [vmem:[%s1480_s0] sm:$0xff]  ;;  %1290 = vset.pattern.permute.xlu0 %v1298_v8  ;;  %1291 = vset.pattern.permute.xlu1 %v1298_v8  ;;  %vm206_vm7 = vcmask 1043584  }
   0x3   :  { %v1272_v4 = vpack.c.bf16 %v26_v1, %v22_v0  ;;  %v1278_v9 = vpack.c.bf16 %v28_v6, %v24_v5  ;;  %v25_v10 = vld [vmem:[%s1480_s0 + $0x20] sm:$0xf]  ;;  %v23_v11 = vld [vmem:[%s1480_s0 + $0x10] sm:$0xff]  ;;  %197 = vst.msk [vmem:[#allocation2 + $0xc] sm:$0xf] %vm196_vm4, %v1297_v3  ;;  %v1395_v27 = vld [vmem:[%s1483_s3 + $0x8] sm:$0xff] }
   0x4   :  { %v27_v12 = vld [vmem:[%s1480_s0 + $0x30] sm:$0xf]  ;;  %v1275_v13 = vpack.c.bf16 %v25_v10, %v21_v7  ;;  %v29_v15 = vld [vmem:[%s1481_s2] sm:$0xf]  ;;  %212 = vst.msk [vmem:[#allocation2 + $0x1c] sm:$0xf] %vm196_vm4, %v1297_v3 }
   0x5   :  { %1274 = vmatprep.subr.msk.bf16.mxu0 %vm1339_vm2, %v1272_v4  ;;  %v1281_v14 = vpack.c.bf16 %v27_v12, %v23_v11  ;;  %1280 = vmatprep.subr.msk.bf16.mxu1 %vm1339_vm2, %v1278_v9  ;;  %v20_v16 = vld [vmem:[%s1482_s1] sm:$0xf]  ;;  %214 = vst.msk [vmem:[#allocation2 + $0x10] sm:$0xf] %vm196_vm4, %v1297_v3  ;;  %198 = vst.msk [vmem:[#allocation2] sm:$0xf] %vm196_vm4, %v1297_v3 }
   0x6   :  { %32 = vperm.xlu0 %1290, %v29_v15   ;;  %1277 = vmatpush1.bf16.msk.msra.mxu0 %vm1339_vm2, %v1275_v13  ;;  %s1300_s1 = smov 16   ;;  %vm207_vm8 = vcmask 130052   ;;  %vm203_vm9 = vcmask 130048   ;;  %v1404_v34 = vld [vmem:[%s1483_s3] sm:$0xff]  ;;  %vm388_vm11 = vcmask 916480   ;;  %v224_v48 = vld [vmem:[%s1483_s3 + $0x10] sm:$0xff] }
   0x7   :  { %1283 = vmatpush1.bf16.msk.msra.mxu1 %vm1339_vm2, %v1281_v14  ;;  %1212 = vmatprep.subr.mxu0 %v1297_v3  ;;  %vm208_vm10 = vmor %vm207_vm8, %vm206_vm7  ;;  %v225_v45 = vld [vmem:[%s1484_s4] sm:$0xff] }
   0x8   :  { %1217 = vmatprep.subr.mxu1 %v1297_v3 }
   0x9   :  { %1160 = vmatmul.mubr.msk.f32.vlgmr.msra.gmra.mrb[0].mxu0 %vm35_vm3, %v20_v16 }
   0xa   :  { %1163 = vmatmul.mubr.msk.f32.vlgmr.msra.gmra.mrb[0].mxu1 %vm35_vm3, %v20_v16  ;;  %1214 = vmatprep.mubr.msk.f32.mxu0 %vm1299_vm5, %v1297_v3 }
   0xb   :  { %1219 = vmatprep.mubr.msk.f32.mxu1 %vm1299_vm5, %v1297_v3 }
  0x85   :  { %v33_v17 = vpop.permute.xlu0 %32 }
  0xdc   :  { %v118_v18 = vpop.f32.mrb[0].mxu0 }
  0xdd   :  { %v189_v19 = vpop.f32.mrb[0].mxu1  ;;  %v119_v20 = vadd.f32 %v118_v18, %v33_v17  ;;  %v120_v22 = vpop.f32.mrb[1].mxu0 }
  0xde   :  { %v190_v21 = vadd.f32 %v189_v19, %v33_v17  ;;  %v191_v23 = vpop.f32.mrb[1].mxu1  ;;  %v121_v24 = vadd.f32 %v120_v22, %v33_v17 }
  0xdf   :  { %v192_v25 = vadd.f32 %v191_v23, %v33_v17  ;;  %195 = vst [vmem:[#allocation2 + $0x8] sm:$0xf] %v119_v20 }
  0xe0   :  { %211 = vst [vmem:[#allocation2 + $0x18] sm:$0xf] %v190_v21  ;;  %200 = vrot.lane.b32.xlu0 %v121_v24, %s1300_s1 }
  0xe1   :  { %216 = vrot.lane.b32.xlu1 %v192_v25, %s1300_s1 }
  0xe6   :  { %v1387_v26 = vld [vmem:[#allocation2 + $0x8] sm:$0xf] }
  0xe7   :  { %1213 = vmatpush3.msk.msra.mxu0 %vm39_vm0, %v1387_v26  ;;  %v1410_v38 = vld [vmem:[#allocation2 + $0x18] sm:$0xf]  ;;  %v845_v41 = vld [vmem:[#allocation2 + $0x8] sm:$0xff] }
  0xe8   :  { %1222 = vmatprep.subr.mxu0 %v1297_v3  ;;  %1215 = vmatmul.mubr.msk.f32.vlgmr.msra.gmra.mrb[2].mxu0 %vm228_vm6, %v1395_v27  ;;  %v847_v42 = vcombine.high %v845_v41, %v845_v41  ;;  %v1069_v43 = vld [vmem:[#allocation2 + $0x18] sm:$0xff] }
  0xe9   :  { %1224 = vmatprep.mubr.msk.f32.mxu0 %vm1299_vm5, %v1297_v3  ;;  %v1071_v44 = vcombine.high %v1069_v43, %v1069_v43 }
 0x152   :  { %v201_v29 = vpop.permute.xlu0 %200 }
 0x153   :  { %v217_v28 = vpop.permute.xlu1 %216  ;;  %v202_v31 = vrot.slane %v201_v29, 4 }
 0x154   :  { %v218_v30 = vrot.slane %v217_v28, 4 }
 0x155   :  { %v204_v33 = vsel %vm203_vm9, %v202_v31, %v201_v29 }
 0x156   :  { %v219_v32 = vsel %vm203_vm9, %v218_v30, %v217_v28  ;;  %209 = vst.msk [vmem:[#allocation2] sm:$0xff] %vm208_vm10, %v204_v33 }
 0x157   :  { %221 = vst.msk [vmem:[#allocation2 + $0x10] sm:$0xff] %vm208_vm10, %v219_v32 }
 0x15d   :  { %v381_v35 = vld [vmem:[#allocation2] sm:$0xff] }
 0x15e   :  { %v226_v36 = vld [vmem:[#allocation2] sm:$0xf]  ;;  %384 = vrot.lane.b32.xlu1 %v381_v35, %s1301_s15  ;;  %v383_v37 = vcombine.high %v381_v35, %v381_v35  ;;  %v621_v39 = vld [vmem:[#allocation2 + $0x10] sm:$0xff] }
 0x15f   :  { %1218 = vmatpush3.msk.msra.mxu1 %vm39_vm0, %v226_v36  ;;  %v623_v40 = vcombine.high %v621_v39, %v621_v39  ;;  %v473_v51 = vld [vmem:[#allocation2 + $0x10] sm:$0xf] }
 0x160   :  { %1227 = vmatprep.subr.mxu1 %v1297_v3  ;;  %1220 = vmatmul.mubr.msk.f32.vlgmr.msra.gmra.mrb[2].mxu1 %vm228_vm6, %v1404_v34 }
 0x161   :  { %386 = vrot.lane.b32.xlu0 %v383_v37, %s1301_s15  ;;  %1228 = vmatpush3.msk.msra.mxu1 %vm39_vm0, %v1410_v38 }
 0x162   :  { %1229 = vmatprep.mubr.msk.f32.mxu1 %vm1299_vm5, %v1297_v3  ;;  %1237 = vmatprep.subr.mxu1 %v1297_v3 }
 0x163   :  { %624 = vrot.lane.b32.xlu1 %v621_v39, %s1301_s15 }
 0x164   :  { %1230 = vmatmul.mubr.msk.f32.vlgmr.msra.gmra.mrb[4].mxu1 %vm228_vm6, %v1395_v27 }
 0x165   :  { %626 = vrot.lane.b32.xlu0 %v623_v40, %s1301_s15  ;;  %1239 = vmatprep.mubr.msk.f32.mxu1 %vm1299_vm5, %v1297_v3 }
 0x167   :  { %848 = vrot.lane.b32.xlu1 %v845_v41, %s1301_s15 }
 0x169   :  { %850 = vrot.lane.b32.xlu0 %v847_v42, %s1301_s15 }
 0x16b   :  { %1072 = vrot.lane.b32.xlu1 %v1069_v43, %s1301_s15 }
 0x16d   :  { %1074 = vrot.lane.b32.xlu0 %v1071_v44, %s1301_s15 }
 0x16f   :  { %468 = vperm.xlu1 %1291, %v225_v45  }
 0x1bb   :  { %v301_v60 = vpop.f32.mrb[2].mxu0 }
 0x1bc   :  { %v1216_v61 = vpop.f32.mrb[3].mxu0 }
 0x1d0   :  { %v385_v46 = vpop.permute.xlu1 %384 }
 0x1d3   :  { %v387_v47 = vpop.permute.xlu0 %386 }
 0x1d4   :  { %v389_v49 = vsel %vm388_vm11, %v385_v46, %v387_v47 }
 0x1d5   :  { %v625_v50 = vpop.permute.xlu1 %624  ;;  %1223 = vmatpush3.msk.msra.mxu0 %vm39_vm0, %v389_v49 }
 0x1d6   :  { %1225 = vmatmul.mubr.msk.f32.vlgmr.msra.gmra.mrb[4].mxu0 %vm228_vm6, %v224_v48  ;;  %1232 = vmatprep.subr.mxu0 %v1297_v3 }
 0x1d7   :  { %v627_v52 = vpop.permute.xlu0 %626  ;;  %1233 = vmatpush3.msk.msra.mxu0 %vm39_vm0, %v473_v51  ;;  %1234 = vmatprep.mubr.msk.f32.mxu0 %vm1299_vm5, %v1297_v3 }
 0x1d8   :  { %v628_v53 = vsel %vm388_vm11, %v625_v50, %v627_v52  ;;  %1242 = vmatprep.subr.mxu0 %v1297_v3 }
 0x1d9   :  { %1238 = vmatpush3.msk.msra.mxu1 %vm39_vm0, %v628_v53  ;;  %v849_v54 = vpop.permute.xlu1 %848 }
 0x1da   :  { %1235 = vmatmul.mubr.msk.f32.vlgmr.msra.gmra.mrb[6].mxu0 %vm228_vm6, %v1404_v34  ;;  %1240 = vmatmul.mubr.msk.f32.vlgmr.msra.gmra.mrb[6].mxu1 %vm228_vm6, %v224_v48 }
 0x1db   :  { %1243 = vmatpush3.msk.msra.mxu0 %vm39_vm0, %v389_v49  ;;  %1247 = vmatprep.subr.mxu1 %v1297_v3  ;;  %v851_v55 = vpop.permute.xlu0 %850 }
 0x1dc   :  { %v852_v56 = vsel %vm388_vm11, %v849_v54, %v851_v55  ;;  %1248 = vmatpush3.msk.msra.mxu1 %vm39_vm0, %v1387_v26  ;;  %1249 = vmatprep.mubr.msk.f32.mxu1 %vm1299_vm5, %v1297_v3 }
 0x1dd   :  { %1244 = vmatprep.mubr.msk.f32.mxu0 %vm1299_vm5, %v1297_v3  ;;  %1252 = vmatprep.subr.mxu0 %v1297_v3  ;;  %v1073_v58 = vpop.permute.xlu1 %1072 }
 0x1de   :  { %1257 = vmatprep.subr.mxu1 %v1297_v3  ;;  %1245 = vmatmul.mubr.msk.f32.vlgmr.msra.gmra.mrb[8].mxu0 %vm228_vm6, %v1395_v27 }
 0x1df   :  { %1250 = vmatmul.mubr.msk.f32.vlgmr.msra.gmra.mrb[8].mxu1 %vm228_vm6, %v1404_v34  ;;  %1253 = vmatpush3.msk.msra.mxu0 %vm39_vm0, %v852_v56  ;;  %v1075_v57 = vpop.permute.xlu0 %1074 }
 0x1e0   :  { %1258 = vmatpush3.msk.msra.mxu1 %vm39_vm0, %v628_v53  ;;  %1254 = vmatprep.mubr.msk.f32.mxu0 %vm1299_vm5, %v1297_v3  ;;  %v1076_v59 = vsel %vm388_vm11, %v1073_v58, %v1075_v57 }
 0x1e1   :  { %1259 = vmatprep.mubr.msk.f32.mxu1 %vm1299_vm5, %v1297_v3  ;;  %1262 = vmatprep.subr.mxu0 %v1297_v3 }
 0x1e2   :  { %1267 = vmatprep.subr.mxu1 %v1297_v3  ;;  %1255 = vmatmul.mubr.msk.f32.vlgmr.msra.gmra.mrb[10].mxu0 %vm228_vm6, %v224_v48 }
 0x1e3   :  { %1260 = vmatmul.mubr.msk.f32.vlgmr.msra.gmra.mrb[10].mxu1 %vm228_vm6, %v1395_v27  ;;  %1263 = vmatpush3.msk.msra.mxu0 %vm39_vm0, %v1410_v38 }
 0x1e4   :  { %1268 = vmatpush3.msk.msra.mxu1 %vm39_vm0, %v1076_v59  ;;  %1264 = vmatprep.mubr.msk.f32.mxu0 %vm1299_vm5, %v1297_v3 }
 0x1e5   :  { %1269 = vmatprep.mubr.msk.f32.mxu1 %vm1299_vm5, %v1297_v3 }
 0x1e6   :  { %1265 = vmatmul.mubr.msk.f32.vlgmr.msra.gmra.mrb[12].mxu0 %vm228_vm6, %v1404_v34 }
 0x1e7   :  { %1270 = vmatmul.mubr.msk.f32.vlgmr.msra.gmra.mrb[12].mxu1 %vm228_vm6, %v224_v48 }
 0x1ee   :  { %v469_v7 = vpop.permute.xlu1 %468 }
 0x233   :  { %v377_v62 = vpop.f32.mrb[2].mxu1 }
 0x234   :  { %v378_v63 = vadd.f32 %v377_v62, %v301_v60  ;;  %v1221_v0 = vpop.f32.mrb[3].mxu1 }
 0x237   :  { %v544_v1 = vpop.f32.mrb[4].mxu1 }
 0x238   :  { %v1231_v2 = vpop.f32.mrb[5].mxu1 }
 0x2a9   :  { %v461_v4 = vpop.f32.mrb[4].mxu0 }
 0x2aa   :  { %v465_v5 = vadd.f32 %v461_v4, %v378_v63  ;;  %v1226_v6 = vpop.f32.mrb[5].mxu0 }
 0x2ac   :  { %v471_v12 = vadd.f32 %v469_v7, %v465_v5 }
 0x2ad   :  { %v617_v8 = vpop.f32.mrb[6].mxu0  ;;  %v697_v9 = vpop.f32.mrb[6].mxu1 }
 0x2ae   :  { %v618_v10 = vadd.f32 %v617_v8, %v544_v1  ;;  %v1236_v3 = vpop.f32.mrb[7].mxu0  ;;  %v1241_v11 = vpop.f32.mrb[7].mxu1  ;;  %v472_v20 = vmax.f32 %v471_v12, 0.0 }
 0x2b0   :  { %v701_v13 = vadd.f32 %v697_v9, %v618_v10 }
 0x2b1   :  { %v771_v14 = vpop.f32.mrb[8].mxu0 }
 0x2b2   :  { %v702_v15 = vadd.f32 %v701_v13, %v469_v7  ;;  %v841_v16 = vpop.f32.mrb[8].mxu1  ;;  %v1246_v17 = vpop.f32.mrb[9].mxu0 }
 0x2b3   :  { %v842_v18 = vadd.f32 %v841_v16, %v771_v14  ;;  %v1251_v19 = vpop.f32.mrb[9].mxu1 }
 0x2b4   :  { %v703_v21 = vmax.f32 %v702_v15, 0.0 }
 0x2b5   :  { %v921_v22 = vpop.f32.mrb[10].mxu0 }
 0x2b6   :  { %v704_v23 = vmax.f32 %v472_v20, %v703_v21  ;;  %v925_v24 = vadd.f32 %v921_v22, %v842_v18  ;;  %v1256_v25 = vpop.f32.mrb[11].mxu0  ;;  %v995_v26 = vpop.f32.mrb[10].mxu1 }
 0x2b7   :  { %v1261_v27 = vpop.f32.mrb[11].mxu1 }
 0x2b8   :  { %v926_v28 = vadd.f32 %v925_v24, %v469_v7 }
 0x2b9   :  { %v1065_v29 = vpop.f32.mrb[12].mxu0 }
 0x2ba   :  { %v927_v30 = vmax.f32 %v926_v28, 0.0  ;;  %v1066_v31 = vadd.f32 %v1065_v29, %v995_v26  ;;  %v1145_v32 = vpop.f32.mrb[12].mxu1  ;;  %v1266_v33 = vpop.f32.mrb[13].mxu0 }
 0x2bb   :  { %v1271_v34 = vpop.f32.mrb[13].mxu1 }
 0x2bc   :  { %v928_v35 = vmax.f32 %v704_v23, %v927_v30  ;;  %v1149_v36 = vadd.f32 %v1145_v32, %v1066_v31 }
 0x2be   :  { %v1150_v37 = vadd.f32 %v1149_v36, %v469_v7 }
 0x2c0   :  { %v1151_v38 = vmax.f32 %v1150_v37, 0.0 }
 0x2c2   :  { %v1152_v39 = vmax.f32 %v928_v35, %v1151_v38 }
 0x2c4   :  { %1153 = vst [vmem:[%s1485_s5] sm:$0xff] %v1152_v39 }

</bundles_post_ra>
